<compile_context>
chip_gen: v6e
topology: v6e:2x2x1
jax: 0.10.0
libtpu: 0.0.40
codegen_flags: <defaults>
</compile_context>

<pallas_src>
import functools

import jax
import jax.numpy as jnp
from jax.experimental import pallas as pl
from jax.experimental.pallas import tpu as pltpu

ALPHA = 0.25
GAMMA = 2.0
LANES = 128
SUBLANES = 8
ROW_QUANT = 32          # row granularity of main-path tiles (safe for f32/bf16/int8 packing)
_NEUTRAL_X = 200.0      # bce(200, 1) == 0 exactly in f32  -> focal contribution is exactly 0
_NEUTRAL_T = 1


def _modulating(one_minus_pt, gamma):
    # gamma is a compile-time constant; avoid float pow (= exp(g*log(x))) for
    # integer gamma -> VPU multiplies instead of EUP transcendentals.
    g = float(gamma)
    if g == 2.0:
        return one_minus_pt * one_minus_pt
    if g.is_integer() and g >= 0:
        return one_minus_pt ** int(g)
    return one_minus_pt ** gamma


def _focal_terms(x, t, gamma):
    """(1-pt)^gamma * bce, elementwise, f32 (alpha applied by the caller)."""
    x = x.astype(jnp.float32)
    t = t.astype(jnp.float32)
    # Numerically stable binary_cross_entropy_with_logits (reduction='none'):
    #   bce = max(x, 0) - x*t + log(1 + exp(-|x|))
    bce = jnp.maximum(x, 0.0) - x * t + jnp.log1p(jnp.exp(-jnp.abs(x)))
    pt = jnp.exp(-bce)
    return _modulating(1.0 - pt, gamma) * bce


def _focal_loss_kernel(x_ref, t_ref, o_ref, acc_ref, *, gamma, tile_rows):
    i = pl.program_id(1)                    # reduction ("arbitrary") axis

    @pl.when(i == 0)
    def _():
        acc_ref[...] = jnp.zeros_like(acc_ref)

    contrib = _focal_terms(x_ref[...], t_ref[...], gamma)

    # Fold the (tile_rows, 128) tile into one vreg-shaped partial sum.  The
    # (tile_rows//8, 8, 128) grouping keeps each slice a native (8,128) tile,
    # so the axis-0 sum is pure VPU vreg adds (no XLU, no big-accumulator RMW).
    acc_ref[...] += contrib.reshape(tile_rows // SUBLANES, SUBLANES, LANES).sum(axis=0)

    @pl.when(i == pl.num_programs(1) - 1)
    def _():
        # Lane-dense, unmasked (8,128) partial-sum store; the final XLU-style
        # reduce + /N is done on this tiny array in the wrapper.
        o_ref[...] = acc_ref[...]


def _focal_partial_sums(x2, t2, *, tile_rows, num_cores, steps, gamma):
    """pallas_call over an exactly-tiled (num_cores*steps*tile_rows, 128) slab."""
    kernel = functools.partial(_focal_loss_kernel, gamma=float(gamma), tile_rows=tile_rows)
    in_map = lambda c, i: (c * steps + i, 0)
    return pl.pallas_call(
        kernel,
        out_shape=jax.ShapeDtypeStruct((num_cores * SUBLANES, LANES), jnp.float32),
        grid_spec=pltpu.PrefetchScalarGridSpec(
            num_scalar_prefetch=0,
            grid=(num_cores, steps),
            in_specs=[
                pl.BlockSpec((tile_rows, LANES), in_map),
                pl.BlockSpec((tile_rows, LANES), in_map),
            ],
            out_specs=pl.BlockSpec((SUBLANES, LANES), lambda c, i: (c, 0)),
            scratch_shapes=[pltpu.VMEM((SUBLANES, LANES), jnp.float32)],
        ),
        compiler_params=pltpu.CompilerParams(
            dimension_semantics=("parallel", "arbitrary"),
            vmem_limit_bytes=32 * 1024 * 1024,
        ),
    )(x2, t2)


def _detect_num_tensorcores():
    # TODO(synk): no stable public "TensorCores per chip" query; probe a few
    # likely attributes and fall back to 1 (single-core grid is correct on all
    # chips; v7x callers can pass num_cores=2 explicitly for the 2-TC split).
    try:
        info = pltpu.get_tpu_info()
        for name in ("num_cores", "num_tensorcores", "tensorcores_per_chip", "core_count"):
            v = getattr(info, name, None)
            if isinstance(v, int) and v > 0:
                return min(2, int(v))
    except Exception:
        pass
    try:
        d = jax.devices()[0]
        for name in ("num_cores", "core_count"):
            v = getattr(d, name, None)
            if isinstance(v, int) and v > 0:
                return min(2, int(v))
    except Exception:
        pass
    return 1


def focal_loss(inputs, targets, alpha=ALPHA, gamma=GAMMA, *,
               max_tile_rows=2048, num_cores=None):
    """Pallas TPU focal loss, reduction='mean'. Returns a scalar f32.

    `targets` may be f32/bf16/int8/bool -- it is streamed in its incoming
    dtype (the kernel upcasts), so pass narrow dtypes to save HBM bandwidth.
    """
    assert inputs.shape == targets.shape
    n_total = int(inputs.size)

    if num_cores is None:
        num_cores = _detect_num_tensorcores()
    num_cores = max(1, int(num_cores))

    # Flatten once (layout-collapse; no value-changing passes over the data).
    x_flat = inputs.reshape(-1)
    t_flat = targets.reshape(-1)

    rows_floor = n_total // LANES
    # Aim for >= ~8 reduction steps per core so the (<1 super-step) tail stays
    # a small fraction, capped at max_tile_rows (1 MiB f32 block).
    tr = (rows_floor // (8 * num_cores) // ROW_QUANT) * ROW_QUANT
    tile_rows = min(int(max_tile_rows), max(ROW_QUANT, tr))
    quantum = tile_rows * num_cores
    steps = rows_floor // quantum

    if steps == 0:
        # Small input: a single full-array block.  Pad the (small) tail with
        # focal-neutral values so no in-kernel masking is needed.
        rows_needed = -(-n_total // LANES)
        rows8 = max(ROW_QUANT, ((rows_needed + ROW_QUANT - 1) // ROW_QUANT) * ROW_QUANT)
        n_pad = rows8 * LANES - n_total
        xs = jnp.pad(x_flat, (0, n_pad), constant_values=_NEUTRAL_X) if n_pad else x_flat
        ts = jnp.pad(t_flat, (0, n_pad), constant_values=_NEUTRAL_T) if n_pad else t_flat
        partial = _focal_partial_sums(
            xs.reshape(rows8, LANES), ts.reshape(rows8, LANES),
            tile_rows=rows8, num_cores=1, steps=1, gamma=gamma)
        total = jnp.sum(partial)
    else:
        # Exactly-tiled prefix through the kernel: no pad pass, no mask.
        rows_main = quantum * steps
        n_main = rows_main * LANES
        x2 = x_flat[:n_main].reshape(rows_main, LANES)
        t2 = t_flat[:n_main].reshape(rows_main, LANES)
        partial = _focal_partial_sums(
            x2, t2, tile_rows=tile_rows, num_cores=num_cores, steps=steps, gamma=gamma)
        total = jnp.sum(partial)
        if n_main < n_total:
            # <1 super-step remainder: tiny plain-XLA side computation
            # (cheaper than an extra full-array pad/copy HBM pass).
            total = total + jnp.sum(_focal_terms(x_flat[n_main:], t_flat[n_main:], gamma))

    # alpha folded in once at the end (scalar), mean = sum / N.
    return (jnp.float32(alpha) * total / jnp.float32(n_total)).astype(jnp.float32)


def focal_loss_ref(inputs, targets, alpha=ALPHA, gamma=GAMMA):
    return jnp.float32(alpha) * jnp.mean(_focal_terms(inputs, targets, gamma))


if __name__ == "__main__":
    key = jax.random.PRNGKey(0)
    k1, k2, k3, k4, k5, k6 = jax.random.split(key, 6)

    # 1) Small NCHW-style logits, binary f32 targets (single-block small path).
    x = jax.random.normal(k1, (2, 4, 16, 16), dtype=jnp.float32)
    t = (jax.random.uniform(k2, (2, 4, 16, 16)) > 0.5).astype(jnp.float32)
    loss = jax.block_until_ready(focal_loss(x, t))
    ref = focal_loss_ref(x, t)
    assert jnp.allclose(loss, ref, atol=1e-5, rtol=1e-5), (loss, ref)

    # 2) Awkward size: exercises exactly-tiled prefix + plain-XLA tail.
    x2 = jax.random.normal(k3, (3, 5, 17, 19), dtype=jnp.float32)
    t2 = (jax.random.uniform(k4, (3, 5, 17, 19)) > 0.5).astype(jnp.float32)
    loss2 = jax.block_until_ready(focal_loss(x2, t2))
    ref2 = focal_loss_ref(x2, t2)
    assert jnp.allclose(loss2, ref2, atol=1e-5, rtol=1e-5), (loss2, ref2)

    # 3) Multi-step main path with narrow (bf16) targets streamed as-is.
    x3 = jax.random.normal(k5, (2, 4, 32, 32), dtype=jnp.float32)
    t3 = (jax.random.uniform(k6, (2, 4, 32, 32)) > 0.5).astype(jnp.bfloat16)
    loss3 = jax.block_until_ready(focal_loss(x3, t3))
    ref3 = focal_loss_ref(x3, t3)
    assert jnp.allclose(loss3, ref3, atol=1e-5, rtol=1e-5), (loss3, ref3)

    print("KERNEL_OK")
</pallas_src>

<mosaic_0001>
module attributes {stable_mosaic.version = 11 : i64} {
  func.func @_focal_loss_kernel(%arg0: i32, %arg1: i32, %arg2: memref<32x128xf32, #tpu.memory_space<vmem>>, %arg3: memref<32x128xf32, #tpu.memory_space<vmem>>, %arg4: memref<8x128xf32, #tpu.memory_space<vmem>>, %arg5: memref<8x128xf32, #tpu.memory_space<vmem>>) attributes {dimension_semantics = [#tpu.dimension_semantics<parallel>, #tpu.dimension_semantics<arbitrary>], iteration_bounds = array<i64: 1, 1>, scalar_prefetch = 0 : i64, scratch_operands = 1 : i64, tpu.core_type = #tpu.core_type<tc>, window_params = [{transform_indices = @transform_0, window_bounds = array<i64: 32, 128>}, {transform_indices = @transform_1, window_bounds = array<i64: 32, 128>}, {transform_indices = @transform_2, window_bounds = array<i64: 8, 128>}]} {
    %c0_i32 = arith.constant 0 : i32
    %0 = arith.cmpi eq, %arg1, %c0_i32 : i32
    %1 = arith.extui %0 : i1 to i32
    %c0_i32_0 = arith.constant 0 : i32
    %2 = arith.cmpi ne, %1, %c0_i32_0 : i32
    scf.if %2 {
      %cst_14 = arith.constant 0.000000e+00 : f32
      %30 = vector.broadcast %cst_14 : f32 to vector<8x128xf32>
      %c0_15 = arith.constant 0 : index
      %c0_16 = arith.constant 0 : index
      %31 = vector.load %arg5[%c0_15, %c0_16] : memref<8x128xf32, #tpu.memory_space<vmem>>, vector<8x128xf32>
      tpu.vector_store %arg5[%c0_15, %c0_16], %30 {strides = array<i32>} : memref<8x128xf32, #tpu.memory_space<vmem>>, vector<8x128xf32>,
    } else {
    }
    %c0 = arith.constant 0 : index
    %c0_1 = arith.constant 0 : index
    %3 = vector.load %arg2[%c0, %c0_1] : memref<32x128xf32, #tpu.memory_space<vmem>>, vector<32x128xf32>
    %c0_2 = arith.constant 0 : index
    %c0_3 = arith.constant 0 : index
    %4 = vector.load %arg3[%c0_2, %c0_3] : memref<32x128xf32, #tpu.memory_space<vmem>>, vector<32x128xf32>
    %cst = arith.constant 0.000000e+00 : f32
    %5 = vector.broadcast %cst : f32 to vector<32x128xf32>
    %6 = arith.maximumf %3, %5 : vector<32x128xf32>
    %7 = arith.mulf %3, %4 : vector<32x128xf32>
    %8 = arith.subf %6, %7 : vector<32x128xf32>
    %9 = math.absf %3 : vector<32x128xf32>
    %cst_4 = arith.constant 0.000000e+00 : f32
    %10 = vector.broadcast %cst_4 : f32 to vector<32x128xf32>
    %11 = arith.subf %10, %9 : vector<32x128xf32>
    %12 = math.exp %11 : vector<32x128xf32>
    %13 = math.log1p %12 : vector<32x128xf32>
    %14 = arith.addf %8, %13 : vector<32x128xf32>
    %cst_5 = arith.constant 0.000000e+00 : f32
    %15 = vector.broadcast %cst_5 : f32 to vector<32x128xf32>
    %16 = arith.subf %15, %14 : vector<32x128xf32>
    %17 = math.exp %16 : vector<32x128xf32>
    %cst_6 = arith.constant 1.000000e+00 : f32
    %18 = vector.broadcast %cst_6 : f32 to vector<32x128xf32>
    %19 = arith.subf %18, %17 : vector<32x128xf32>
    %20 = arith.mulf %19, %19 : vector<32x128xf32>
    %21 = arith.mulf %20, %14 : vector<32x128xf32>
    %c0_7 = arith.constant 0 : index
    %c0_8 = arith.constant 0 : index
    %22 = vector.load %arg5[%c0_7, %c0_8] : memref<8x128xf32, #tpu.memory_space<vmem>>, vector<8x128xf32>
    %23 = vector.shape_cast %21 : vector<32x128xf32> to vector<4x8x128xf32>
    %cst_9 = arith.constant dense<0.000000e+00> : vector<8x128xf32>
    %24 = vector.multi_reduction <add>, %23, %cst_9 [0] : vector<4x8x128xf32> to vector<8x128xf32>
    %25 = arith.addf %22, %24 : vector<8x128xf32>
    %c0_10 = arith.constant 0 : index
    %c0_11 = arith.constant 0 : index
    %26 = vector.load %arg5[%c0_10, %c0_11] : memref<8x128xf32, #tpu.memory_space<vmem>>, vector<8x128xf32>
    tpu.vector_store %arg5[%c0_10, %c0_11], %25 {strides = array<i32>} : memref<8x128xf32, #tpu.memory_space<vmem>>, vector<8x128xf32>,
    %c0_i32_12 = arith.constant 0 : i32
    %27 = arith.cmpi eq, %arg1, %c0_i32_12 : i32
    %28 = arith.extui %27 : i1 to i32
    %c0_i32_13 = arith.constant 0 : i32
    %29 = arith.cmpi ne, %28, %c0_i32_13 : i32
    scf.if %29 {
      %c0_14 = arith.constant 0 : index
      %c0_15 = arith.constant 0 : index
      %30 = vector.load %arg5[%c0_14, %c0_15] : memref<8x128xf32, #tpu.memory_space<vmem>>, vector<8x128xf32>
      %c0_16 = arith.constant 0 : index
      %c0_17 = arith.constant 0 : index
      %31 = vector.load %arg4[%c0_16, %c0_17] : memref<8x128xf32, #tpu.memory_space<vmem>>, vector<8x128xf32>
      tpu.vector_store %arg4[%c0_16, %c0_17], %30 {strides = array<i32>} : memref<8x128xf32, #tpu.memory_space<vmem>>, vector<8x128xf32>,
    } else {
    }
    return
  }
  func.func @transform_0(%arg0: i32, %arg1: i32) -> (i32, i32) {
    %c1_i32 = arith.constant 1 : i32
    %0 = arith.muli %arg0, %c1_i32 : i32
    %1 = arith.addi %0, %arg1 : i32
    %c0_i32 = arith.constant 0 : i32
    %c0_i32_0 = arith.constant 0 : i32
    return %1, %c0_i32 : i32, i32
  }
  func.func @transform_1(%arg0: i32, %arg1: i32) -> (i32, i32) {
    %c1_i32 = arith.constant 1 : i32
    %0 = arith.muli %arg0, %c1_i32 : i32
    %1 = arith.addi %0, %arg1 : i32
    %c0_i32 = arith.constant 0 : i32
    %c0_i32_0 = arith.constant 0 : i32
    return %1, %c0_i32 : i32, i32
  }
  func.func @transform_2(%arg0: i32, %arg1: i32) -> (i32, i32) {
    %c0_i32 = arith.constant 0 : i32
    %c0_i32_0 = arith.constant 0 : i32
    return %arg0, %c0_i32 : i32, i32
  }
}

</mosaic_0001>

<bundles_post_ra>
// kernel: tpu_custom_call.1
= control target key start
LH: loop header
LB: loop body
LE: loop exit
PB: predicated region body
PF: predicated region fallthrough
CT: control target
= control target key end

     0   :  { %7 = vsyncpa [#allocation4], 0  ;;  %s330_s0 = inlined_call_operand.hbm [shape: f32[32,128], index: 0, kind: input, shape index: {}]   ;;  %s331_s1 = inlined_call_operand.hbm [shape: f32[32,128], index: 1, kind: input, shape index: {}]   ;;  %s332_s2 = inlined_call_operand.hbm [shape: f32[8,128], index: 2, kind: output, shape index: {}]  }
   0x1   :  { %8 = vsyncpa [#allocation7], 0 }
   0x2   :  { %9 = vsyncpa [#allocation5], 0  ;;  %s279_s9 = smov [#allocation3]  }
   0x3   :  { %s19_s10 = sshll.u32 %s279_s9, 4  ;;  %s20_s10 = int_to_ptr.vmem [resolvable:$true] %s19_s10 }
   0x4   :  { %s221_s11 = scalar_lea.vmem %s20_s10, 512  ;;  %p226_p1 = scmp.lt.s32.totalorder %s20_s10, %s20_s10 }
   0x5   :  { %p222_p0 = scmp.ne.s32.totalorder %s20_s10, %s221_s11  ;;  %p227_p2 = scmp.lt.s32.totalorder %s221_s11, %s221_s11 }
   0x7   :  { %p228_p3 = por %p227_p2, %p226_p1 }
   0x9   :  { %p229_p4 = pnand %p228_p3, %p222_p0 }
   0xb   :  { %232 = shalt.err (!%p229_p4)
}
   0xc   :  { %s280_s12 = smov 128   ;;  %s281_s13 = smov 8  }
   0xd   :  { %25 = dma.hbm_to_vmem [thread:$0]  %s330_s0, 512, %s20_s10, [#allocation4], %s280_s12, %s280_s12, %s281_s13  }
   0xe   :  { %s282_s16 = smov [#allocation6]  }
   0xf   :  { %s35_s17 = sshll.u32 %s282_s16, 4  ;;  %s36_s17 = int_to_ptr.vmem [resolvable:$true] %s35_s17 }
  0x10   :  { %s241_s18 = scalar_lea.vmem %s36_s17, 512  ;;  %p246_p6 = scmp.lt.s32.totalorder %s36_s17, %s36_s17 }
  0x11   :  { %p242_p5 = scmp.ne.s32.totalorder %s36_s17, %s241_s18  ;;  %p247_p7 = scmp.lt.s32.totalorder %s241_s18, %s241_s18 }
  0x13   :  { %p248_p8 = por %p247_p7, %p246_p6 }
  0x15   :  { %p249_p9 = pnand %p248_p8, %p242_p5 }
  0x17   :  { %252 = shalt.err (!%p249_p9)
}
  0x18   :  { %41 = dma.hbm_to_vmem [thread:$0]  %s331_s1, 512, %s36_s17, [#allocation7], %s280_s12, %s280_s12, %s281_s13  }
  0x19   :  { %273 = dma.done.wait [#allocation4], 512  }
  0x1a   :  { %274 = vsyncadd [#allocation4], 4294966784 }
  0x1b   :  { %275 = dma.done.wait [#allocation7], 512  }
  0x1c   :  { %276 = vsyncadd [#allocation7], 4294966784  ;;  %v57_v0 = vld [vmem:[#allocation3] sm:$0xff]  ;;  %v58_v1 = vld [vmem:[#allocation3 + $0x8] sm:$0xff]  ;;  %s283_s0 = smov [#allocation8]  }
  0x1d   :  { %v305_v2 = vld [vmem:[#allocation3 + $0x10] sm:$0xff]  ;;  %v307_v3 = vld [vmem:[#allocation3 + $0x18] sm:$0xff]  ;;  %v77_v4 = vand.u32 2147483647, %v57_v0  ;;  %v78_v5 = vand.u32 2147483647, %v58_v1 }
  0x1e   :  { %v79_v6 = vand.u32 2147483647, %v305_v2  ;;  %v80_v7 = vand.u32 2147483647, %v307_v3  ;;  %v61_v26 = vld [vmem:[#allocation6] sm:$0xff]  ;;  %v62_v28 = vld [vmem:[#allocation6 + $0x8] sm:$0xff] }
  0x1f   :  { %v81_v8 = vsub.f32 0.0, %v77_v4  ;;  %v82_v9 = vsub.f32 0.0, %v78_v5  ;;  %v63_v29 = vld [vmem:[#allocation6 + $0x10] sm:$0xff]  ;;  %v64_v32 = vld [vmem:[#allocation6 + $0x18] sm:$0xff]  ;;  %v65_v33 = vmax.f32 %v57_v0, 0.0  ;;  %v69_v34 = vmul.f32 %v61_v26, %v57_v0  ;;  %s174_s1 = sshll.u32 %s283_s0, 4  ;;  %s175_s1 = int_to_ptr.vmem [resolvable:$true] %s174_s1 }
  0x20   :  { %v83_v10 = vsub.f32 0.0, %v79_v6  ;;  %v84_v11 = vsub.f32 0.0, %v80_v7  ;;  %v66_v37 = vmax.f32 %v58_v1, 0.0  ;;  %v70_v38 = vmul.f32 %v62_v28, %v58_v1  ;;  %s253_s21 = scalar_lea.vmem %s175_s1, 128  ;;  %p258_p11 = scmp.lt.s32.totalorder %s175_s1, %s175_s1 }
  0x21   :  { %v85_v12 = vmul.f32 1.442695, %v81_v8  ;;  %v87_v13 = vmul.f32 1.442695, %v82_v9  ;;  %v67_v41 = vmax.f32 %v305_v2, 0.0  ;;  %v71_v42 = vmul.f32 %v63_v29, %v305_v2  ;;  %p254_p10 = scmp.ne.s32.totalorder %s175_s1, %s253_s21  ;;  %p259_p12 = scmp.lt.s32.totalorder %s253_s21, %s253_s21 }
  0x22   :  { %v89_v14 = vmul.f32 1.442695, %v83_v10  ;;  %v91_v15 = vmul.f32 1.442695, %v84_v11  ;;  %v68_v44 = vmax.f32 %v307_v3, 0.0  ;;  %v72_v45 = vmul.f32 %v64_v32, %v307_v3 }
  0x23   :  { %189 = vpow2.f32 %v85_v12  ;;  %v73_v49 = vsub.f32 %v65_v33, %v69_v34  ;;  %v74_v54 = vsub.f32 %v66_v37, %v70_v38  ;;  %v75_v59 = vsub.f32 %v67_v41, %v71_v42  ;;  %p260_p13 = por %p259_p12, %p258_p11 }
  0x24   :  { %191 = vpow2.f32 %v87_v13  ;;  %v76_v1 = vsub.f32 %v68_v44, %v72_v45 }
  0x25   :  { %193 = vpow2.f32 %v89_v14  ;;  %p261_p0 = pnand %p260_p13, %p254_p10 }
  0x26   :  { %195 = vpow2.f32 %v91_v15 }
  0x30   :  { %v190_v16 = vpop.eup %189 }
  0x31   :  { %v192_v17 = vpop.eup %191  ;;  %v93_v18 = vadd.f32 1.0, %v190_v16  ;;  %v96_v24 = vmul.f32 -0.5, %v190_v16  ;;  %v99_v35 = vand.u32 2147483647, %v190_v16 }
  0x32   :  { %v194_v19 = vpop.eup %193  ;;  %v102_v20 = vadd.f32 1.0, %v192_v17  ;;  %v105_v25 = vmul.f32 -0.5, %v192_v17  ;;  %v108_v39 = vand.u32 2147483647, %v192_v17 }
  0x33   :  { %v196_v21 = vpop.eup %195  ;;  %197 = vlog2.f32 %v93_v18  ;;  %v111_v22 = vadd.f32 1.0, %v194_v19  ;;  %v114_v27 = vmul.f32 -0.5, %v194_v19  ;;  %v97_v30 = vadd.f32 1.0, %v96_v24 }
  0x34   :  { %199 = vlog2.f32 %v102_v20  ;;  %v120_v23 = vadd.f32 1.0, %v196_v21  ;;  %v123_v31 = vmul.f32 -0.5, %v196_v21  ;;  %v106_v36 = vadd.f32 1.0, %v105_v25 }
  0x35   :  { %201 = vlog2.f32 %v111_v22  ;;  %v115_v40 = vadd.f32 1.0, %v114_v27  ;;  %v117_v43 = vand.u32 2147483647, %v194_v19  ;;  %v98_v46 = vmul.f32 %v190_v16, %v97_v30 }
  0x36   :  { %203 = vlog2.f32 %v120_v23  ;;  %v124_v47 = vadd.f32 1.0, %v123_v31  ;;  %vm315_vm0 = vcmp.lt.f32.partialorder %v99_v35, 0.0004427343  ;;  %v107_v51 = vmul.f32 %v192_v17, %v106_v36 }
  0x37   :  { %v126_v52 = vand.u32 2147483647, %v196_v21  ;;  %vm319_vm1 = vcmp.lt.f32.partialorder %v108_v39, 0.0004427343  ;;  %v116_v57 = vmul.f32 %v194_v19, %v115_v40  ;;  %vm118_vm2 = vcmp.lt.f32.partialorder %v117_v43, 0.0004427343 }
  0x38   :  { %v125_v63 = vmul.f32 %v196_v21, %v124_v47 }
  0x39   :  { %vm127_vm3 = vcmp.lt.f32.partialorder %v126_v52, 0.0004427343 }
  0x40   :  { %v198_v48 = vpop.eup %197 }
  0x41   :  { %v200_v53 = vpop.eup %199  ;;  %v95_v55 = vmul.f32 0.6931472, %v198_v48 }
  0x42   :  { %v202_v58 = vpop.eup %201  ;;  %v104_v60 = vmul.f32 0.6931472, %v200_v53 }
  0x43   :  { %v101_v61 = vsel %vm315_vm0, %v98_v46, %v95_v55  ;;  %v113_v62 = vmul.f32 0.6931472, %v202_v58  ;;  %v204_v0 = vpop.eup %203 }
  0x44   :  { %v110_v2 = vsel %vm319_vm1, %v107_v51, %v104_v60  ;;  %v129_v3 = vadd.f32 %v101_v61, %v73_v49  ;;  %v122_v5 = vmul.f32 0.6931472, %v204_v0 }
  0x45   :  { %v119_v4 = vsel %vm118_vm2, %v116_v57, %v113_v62  ;;  %v130_v6 = vadd.f32 %v110_v2, %v74_v54 }
  0x46   :  { %v131_v7 = vadd.f32 %v119_v4, %v75_v59  ;;  %v133_v8 = vsub.f32 0.0, %v129_v3  ;;  %v128_v9 = vsel %vm127_vm3, %v125_v63, %v122_v5 }
  0x47   :  { %v134_v10 = vsub.f32 0.0, %v130_v6  ;;  %v132_v11 = vadd.f32 %v128_v9, %v76_v1 }
  0x48   :  { %v135_v12 = vsub.f32 0.0, %v131_v7  ;;  %v137_v13 = vmul.f32 1.442695, %v133_v8 }
  0x49   :  { %v139_v14 = vmul.f32 1.442695, %v134_v10  ;;  %v136_v15 = vsub.f32 0.0, %v132_v11 }
  0x4a   :  { %205 = vpow2.f32 %v137_v13  ;;  %v141_v16 = vmul.f32 1.442695, %v135_v12 }
  0x4b   :  { %207 = vpow2.f32 %v139_v14  ;;  %v143_v17 = vmul.f32 1.442695, %v136_v15 }
  0x4c   :  { %209 = vpow2.f32 %v141_v16 }
  0x4d   :  { %211 = vpow2.f32 %v143_v17 }
  0x57   :  { %v206_v18 = vpop.eup %205 }
  0x58   :  { %v208_v19 = vpop.eup %207  ;;  %v145_v20 = vsub.f32 1.0, %v206_v18 }
  0x59   :  { %v210_v21 = vpop.eup %209  ;;  %v146_v22 = vsub.f32 1.0, %v208_v19 }
  0x5a   :  { %v147_v23 = vsub.f32 1.0, %v210_v21  ;;  %v149_v24 = vmul.f32 %v145_v20, %v145_v20  ;;  %v212_v25 = vpop.eup %211 }
  0x5b   :  { %v150_v26 = vmul.f32 %v146_v22, %v146_v22  ;;  %v148_v27 = vsub.f32 1.0, %v212_v25 }
  0x5c   :  { %v151_v28 = vmul.f32 %v147_v23, %v147_v23  ;;  %v153_v29 = vmul.f32 %v149_v24, %v129_v3 }
  0x5d   :  { %v154_v30 = vmul.f32 %v150_v26, %v130_v6  ;;  %v152_v31 = vmul.f32 %v148_v27, %v148_v27 }
  0x5e   :  { %v155_v32 = vmul.f32 %v151_v28, %v131_v7 }
  0x5f   :  { %v158_v33 = vadd.f32 %v154_v30, %v153_v29  ;;  %v156_v34 = vmul.f32 %v152_v31, %v132_v11 }
  0x61   :  { %v159_v35 = vadd.f32 %v158_v33, %v155_v32 }
  0x63   :  { %v160_v36 = vadd.f32 %v159_v35, %v156_v34 }
  0x65   :  { %167 = vst [vmem:[#allocation8] sm:$0xff] %v160_v36 }
  0x66   :  { %264 = shalt.err (!%p261_p0)
}
  0x67   :  { %177 = dma.vmem_to_hbm [thread:$0]  %s175_s1, 128, %s332_s2, [#allocation5]  }
  0x68   :  { %277 = dma.done.wait [#allocation5], 128  }
  0x69   :  { %278 = vsyncadd [#allocation5], 4294967168 }
  0x6a   :  { %181 = vsyncpa [#allocation4], 1 }
  0x6b   :  { %182 = vsyncpa [#allocation7], 1 }
  0x6c   :  { %183 = vsyncpa [#allocation5], 1 }

</bundles_post_ra>
